<compile_context>
chip_gen: v5e
topology: v5e:2x2
jax: 0.10.0
libtpu: 0.0.40
codegen_flags: <defaults>
</compile_context>

<pallas_src>
import functools

import jax
import jax.numpy as jnp
from jax.experimental import pallas as pl
from jax.experimental.pallas import tpu as pltpu

_LANE = 128
_MIN_BLOCK_BYTES = 1 << 20        # aim for >= ~1 MiB x blocks (~85% HBM roofline)
_TARGET_STEPS = 8                 # >= 4 grid steps per TensorCore on v7x


def _round_up(v, m):
    return (v + m - 1) // m * m


def _vmem_budgets():
    """Generation-aware scoped-VMEM limit and block budget (v7x: 64 MiB / TC)."""
    cap = 64 * 1024 * 1024
    try:
        info = pltpu.get_tpu_info()
        val = int(getattr(info, "vmem_capacity_bytes", 0) or 0)
        if val > 0:
            cap = val
    except Exception:
        pass
    limit = max(32 * 1024 * 1024, min(int(0.75 * cap), 100 * 1024 * 1024))
    budget = max(8 * 1024 * 1024, limit - 8 * 1024 * 1024)
    return limit, budget


def _largest_divisor_at_most(n, cap):
    cap = max(1, min(cap, n))
    for d in range(cap, 0, -1):
        if n % d == 0:
            return d
    return 1


def _weight_specs(C, Cr):
    # Full-resident parameter blocks (block index independent of the grid).
    return [
        pl.BlockSpec((C, Cr), lambda *idx: (0, 0)),
        pl.BlockSpec((1, Cr), lambda *idx: (0, 0)),
        pl.BlockSpec((Cr, C), lambda *idx: (0, 0)),
        pl.BlockSpec((1, C), lambda *idx: (0, 0)),
    ]


# ---------------------------------------------------------------------------
# Kernels
# ---------------------------------------------------------------------------
def _bam_fused_kernel(x_ref, w1t_ref, b1_ref, w2t_ref, b2_ref, o_ref, *, inv_hw):
    # x_ref: (TB, C, HW).  The dtype cast is fused into the reduction so no
    # f32 copy of the block is materialised in VMEM.
    pooled = jnp.sum(x_ref[...], axis=-1, dtype=jnp.float32) * inv_hw       # (TB, C)
    h = jnp.dot(pooled, w1t_ref[...],
                preferred_element_type=jnp.float32) + b1_ref[...]           # (TB, Cr)
    h = jnp.maximum(h, 0.0)                                                 # ReLU
    out_vec = jnp.dot(h, w2t_ref[...],
                      preferred_element_type=jnp.float32) + b2_ref[...]     # (TB, C)
    out_vec = out_vec.astype(o_ref.dtype)                                   # cast BEFORE broadcast
    o_ref[...] = jnp.broadcast_to(out_vec[:, :, None], o_ref.shape)


def _bam_pool_mlp_kernel(x_ref, w1t_ref, b1_ref, w2t_ref, b2_ref,
                         att_ref, acc_ref, *, inv_hw, hw_total, thw, needs_mask):
    # Pass 1: accumulate spatial sums across HW tiles; MLP on the last tile.
    j = pl.program_id(1)

    @pl.when(j == 0)
    def _():
        acc_ref[...] = jnp.zeros_like(acc_ref)

    x = x_ref[...]                                                  # (1, C, thw)
    if needs_mask:
        # Ragged last HW tile: mask out-of-range columns instead of padding x.
        col = jax.lax.broadcasted_iota(jnp.int32, x.shape, 2) + j * thw
        x = jnp.where(col < hw_total, x, jnp.zeros_like(x))
    acc_ref[...] += jnp.sum(x, axis=-1, dtype=jnp.float32)          # (1, C)

    @pl.when(j == pl.num_programs(1) - 1)
    def _():
        pooled = acc_ref[...] * inv_hw
        h = jnp.dot(pooled, w1t_ref[...],
                    preferred_element_type=jnp.float32) + b1_ref[...]
        h = jnp.maximum(h, 0.0)
        out_vec = jnp.dot(h, w2t_ref[...],
                          preferred_element_type=jnp.float32) + b2_ref[...]
        att_ref[...] = out_vec.reshape(att_ref.shape)               # (1, 1, C) f32


def _bam_broadcast_kernel(att_ref, o_ref):
    # Pass 2: single straight store stream; cast the tiny vector before broadcast.
    vec = att_ref[...].reshape(1, -1).astype(o_ref.dtype)           # (1, C)
    o_ref[...] = jnp.broadcast_to(vec[:, :, None], o_ref.shape)


# ---------------------------------------------------------------------------
# Wrapper
# ---------------------------------------------------------------------------
def _pooled_attention(x3, w1t, b1r, w2t, b2r, inv_hw, block_budget, vmem_limit):
    """Pass 1: (N, C, HW) -> (N, 1, C) float32 attention (avg-pool + MLP)."""
    N, C, HW = x3.shape
    Cr = w1t.shape[1]
    itemsize = jnp.dtype(x3.dtype).itemsize

    # Only the x block is double-buffered (att output and weights are tiny).
    thw_cap = max(_LANE, block_budget // (2 * C * itemsize))
    thw = max(_LANE, (thw_cap // _LANE) * _LANE)
    if thw >= HW:
        thw = HW                       # full-dim block: exempt from the 128 rule
    nhw = pl.cdiv(HW, thw)
    needs_mask = (HW % thw) != 0       # ragged last tile -> mask in-kernel

    att = pl.pallas_call(
        functools.partial(_bam_pool_mlp_kernel, inv_hw=inv_hw, hw_total=HW,
                          thw=thw, needs_mask=needs_mask),
        out_shape=jax.ShapeDtypeStruct((N, 1, C), jnp.float32),
        grid_spec=pltpu.PrefetchScalarGridSpec(
            num_scalar_prefetch=0,
            grid=(N, nhw),
            in_specs=[pl.BlockSpec((1, C, thw), lambda b, j: (b, 0, j))]
                     + _weight_specs(C, Cr),
            out_specs=pl.BlockSpec((1, 1, C), lambda b, j: (b, 0, 0)),
            scratch_shapes=[pltpu.VMEM((1, C), jnp.float32)],
        ),
        compiler_params=pltpu.CompilerParams(
            dimension_semantics=("parallel", "arbitrary"),
            vmem_limit_bytes=vmem_limit),
    )(x3, w1t, b1r, w2t, b2r)
    return att, thw, nhw


def bam_channel_attention(x_nchw, w1, b1, w2, b2, *,
                          block_budget_bytes=None, return_attention=False):
    """x_nchw: (N, C, H, W).  w1: (Cr, C), b1: (Cr,), w2: (C, Cr), b2: (C,).

    return_attention=True returns the (N, C, 1, 1) attention (expand_as is a
    free view in PyTorch); default materialises the broadcast like the module.
    """
    N, C, H, W = x_nchw.shape
    HW = H * W
    Cr = w1.shape[0]
    dtype = x_nchw.dtype
    itemsize = jnp.dtype(dtype).itemsize
    inv_hw = 1.0 / float(HW)

    vmem_limit, auto_budget = _vmem_budgets()
    block_budget = auto_budget if block_budget_bytes is None else block_budget_bytes

    # Parameters: transposed so the kernel computes pooled @ w1t / h @ w2t, f32 accum.
    w1t = w1.T.astype(jnp.float32)            # (C, Cr)
    w2t = w2.T.astype(jnp.float32)            # (Cr, C)
    b1r = b1.reshape(1, Cr).astype(jnp.float32)
    b2r = b2.reshape(1, C).astype(jnp.float32)

    x3 = x_nchw.reshape(N, C, HW)             # metadata-only reshape, no HBM copy

    if return_attention:
        att, _, _ = _pooled_attention(x3, w1t, b1r, w2t, b2r, inv_hw,
                                      block_budget, vmem_limit)
        return att.reshape(N, C)[:, :, None, None].astype(dtype)

    # VMEM layout pads the lane axis to 128, so budget with the padded extent.
    row_bytes = C * _round_up(HW, _LANE) * itemsize

    if 4 * row_bytes <= block_budget:
        # -------- Fused single-pass path: exactly one read + one write of x ----
        tb_vmem = max(1, block_budget // (4 * row_bytes))       # dbl-buffered in+out
        tb_blk = max(1, pl.cdiv(_MIN_BLOCK_BYTES, row_bytes))   # blocks >= ~1 MiB
        tb_cand = max(1, min(tb_vmem, max(tb_blk, pl.cdiv(N, _TARGET_STEPS))))
        tb = _largest_divisor_at_most(N, tb_cand)               # divides N: no pad
        if (N // tb) % 2 and N % 2 == 0:
            # Prefer an even step count so both v7x TensorCores stream real rows.
            tb = _largest_divisor_at_most(N // 2, tb)
        nb = N // tb

        out = pl.pallas_call(
            functools.partial(_bam_fused_kernel, inv_hw=inv_hw),
            out_shape=jax.ShapeDtypeStruct((N, C, HW), dtype),
            grid_spec=pltpu.PrefetchScalarGridSpec(
                num_scalar_prefetch=0,
                grid=(nb,),
                # NOTE: pl.Buffered(3) on the x spec can help v5e/v6e slightly
                # but eats v7x's limited VMEM headroom; kept at the default 2.
                in_specs=[pl.BlockSpec((tb, C, HW), lambda b: (b, 0, 0))]
                         + _weight_specs(C, Cr),
                out_specs=pl.BlockSpec((tb, C, HW), lambda b: (b, 0, 0)),
            ),
            compiler_params=pltpu.CompilerParams(
                dimension_semantics=("parallel",),
                vmem_limit_bytes=vmem_limit),
        )(x3, w1t, b1r, w2t, b2r)
        return out.reshape(N, C, H, W)

    # -------- Two-pass path (C*HW rows too large for a fused block) ------------
    att, thw, nhw = _pooled_attention(x3, w1t, b1r, w2t, b2r, inv_hw,
                                      block_budget, vmem_limit)

    out = pl.pallas_call(
        _bam_broadcast_kernel,
        out_shape=jax.ShapeDtypeStruct((N, C, HW), dtype),
        grid_spec=pltpu.PrefetchScalarGridSpec(
            num_scalar_prefetch=0,
            grid=(N, nhw),
            in_specs=[pl.BlockSpec((1, 1, C), lambda b, j: (b, 0, 0))],
            out_specs=pl.BlockSpec((1, C, thw), lambda b, j: (b, 0, j)),
        ),
        compiler_params=pltpu.CompilerParams(
            dimension_semantics=("parallel", "parallel"),
            vmem_limit_bytes=vmem_limit),
    )(att)
    return out.reshape(N, C, H, W)


# ---------------------------------------------------------------------------
# Reference + test
# ---------------------------------------------------------------------------
def _reference(x_nchw, w1, b1, w2, b2):
    pooled = jnp.mean(x_nchw.astype(jnp.float32), axis=(2, 3))    # (N, C)
    h = jnp.maximum(pooled @ w1.T + b1, 0.0)                      # (N, Cr)
    o = (h @ w2.T + b2).astype(x_nchw.dtype)                      # (N, C)
    return jnp.broadcast_to(o[:, :, None, None], x_nchw.shape)


if __name__ == "__main__":
    key = jax.random.PRNGKey(0)
    kx, k1, kb1, k2, kb2, kx2 = jax.random.split(key, 6)

    # Small shapes consistent with the module (channels divisible by reduction).
    N, C, H, W = 2, 64, 16, 16
    reduction = 16
    Cr = C // reduction

    x = jax.random.normal(kx, (N, C, H, W), dtype=jnp.float32)
    w1 = jax.random.normal(k1, (Cr, C), dtype=jnp.float32) * (1.0 / jnp.sqrt(C))
    b1 = jax.random.normal(kb1, (Cr,), dtype=jnp.float32) * 0.1
    w2 = jax.random.normal(k2, (C, Cr), dtype=jnp.float32) * (1.0 / jnp.sqrt(Cr))
    b2 = jax.random.normal(kb2, (C,), dtype=jnp.float32) * 0.1

    ref = _reference(x, w1, b1, w2, b2)

    # 1) Fused single-pass path (auto budgets, no padding anywhere).
    out = jax.block_until_ready(bam_channel_attention(x, w1, b1, w2, b2))
    assert out.shape == x.shape
    assert jnp.allclose(out, ref, atol=1e-5, rtol=1e-5), "fused path mismatch"

    # 2) Non-128-multiple spatial + odd batch (exercises full-dim HW blocks).
    x_odd = jax.random.normal(kx2, (3, C, 7, 7), dtype=jnp.float32)
    out_odd = jax.block_until_ready(bam_channel_attention(x_odd, w1, b1, w2, b2))
    ref_odd = _reference(x_odd, w1, b1, w2, b2)
    assert jnp.allclose(out_odd, ref_odd, atol=1e-5, rtol=1e-5), "odd-shape mismatch"

    # 3) Two-pass path (forced with a tiny block budget so it runs at small shapes).
    out_2p = jax.block_until_ready(
        bam_channel_attention(x, w1, b1, w2, b2, block_budget_bytes=1))
    assert jnp.allclose(out_2p, ref, atol=1e-5, rtol=1e-5), "two-pass path mismatch"

    # 4) Attention-only variant (skips the broadcast write entirely).
    att_only = jax.block_until_ready(
        bam_channel_attention(x, w1, b1, w2, b2, return_attention=True))
    assert att_only.shape == (N, C, 1, 1)
    assert jnp.allclose(att_only, ref[:, :, :1, :1], atol=1e-5, rtol=1e-5), \
        "attention-only mismatch"

    print("KERNEL_OK")
</pallas_src>

<mosaic_0001>
module attributes {stable_mosaic.version = 11 : i64} {
  func.func @_bam_fused_kernel(%arg0: i32, %arg1: memref<1x64x256xf32, #tpu.memory_space<vmem>>, %arg2: memref<64x4xf32, #tpu.memory_space<vmem>>, %arg3: memref<1x4xf32, #tpu.memory_space<vmem>>, %arg4: memref<4x64xf32, #tpu.memory_space<vmem>>, %arg5: memref<1x64xf32, #tpu.memory_space<vmem>>, %arg6: memref<1x64x256xf32, #tpu.memory_space<vmem>>) attributes {dimension_semantics = [#tpu.dimension_semantics<parallel>], iteration_bounds = array<i64: 2>, scalar_prefetch = 0 : i64, scratch_operands = 0 : i64, tpu.core_type = #tpu.core_type<tc>, window_params = [{transform_indices = @transform_0, window_bounds = array<i64: 1, 64, 256>}, {pipeline_mode = #tpu.pipeline_mode<synchronous>, transform_indices = @transform_1, window_bounds = array<i64: 64, 4>}, {pipeline_mode = #tpu.pipeline_mode<synchronous>, transform_indices = @transform_2, window_bounds = array<i64: 1, 4>}, {pipeline_mode = #tpu.pipeline_mode<synchronous>, transform_indices = @transform_3, window_bounds = array<i64: 4, 64>}, {pipeline_mode = #tpu.pipeline_mode<synchronous>, transform_indices = @transform_4, window_bounds = array<i64: 1, 64>}, {transform_indices = @transform_5, window_bounds = array<i64: 1, 64, 256>}]} {
    %c0 = arith.constant 0 : index
    %c0_0 = arith.constant 0 : index
    %c0_1 = arith.constant 0 : index
    %0 = vector.load %arg1[%c0, %c0_0, %c0_1] : memref<1x64x256xf32, #tpu.memory_space<vmem>>, vector<1x64x256xf32>
    %cst = arith.constant dense<0.000000e+00> : vector<1x64xf32>
    %1 = vector.multi_reduction <add>, %0, %cst [2] : vector<1x64x256xf32> to vector<1x64xf32>
    %cst_2 = arith.constant 3.906250e-03 : f32
    %2 = vector.broadcast %cst_2 : f32 to vector<1x64xf32>
    %3 = arith.mulf %1, %2 : vector<1x64xf32>
    %c0_3 = arith.constant 0 : index
    %c0_4 = arith.constant 0 : index
    %4 = vector.load %arg2[%c0_3, %c0_4] : memref<64x4xf32, #tpu.memory_space<vmem>>, vector<64x4xf32>
    %cst_5 = arith.constant dense<0.000000e+00> : vector<1x4xf32>
    %5 = tpu.matmul %3, %4, %cst_5 {dimension_numbers = #tpu.dot_dimension_numbers<[1], [0], [0], [1], [0, 0, 1, 1], [], []>} : vector<1x64xf32>, vector<64x4xf32>, vector<1x4xf32> -> vector<1x4xf32>
    %c0_6 = arith.constant 0 : index
    %c0_7 = arith.constant 0 : index
    %6 = vector.load %arg3[%c0_6, %c0_7] : memref<1x4xf32, #tpu.memory_space<vmem>>, vector<1x4xf32>
    %7 = arith.addf %5, %6 : vector<1x4xf32>
    %cst_8 = arith.constant 0.000000e+00 : f32
    %8 = vector.broadcast %cst_8 : f32 to vector<1x4xf32>
    %9 = arith.maximumf %7, %8 : vector<1x4xf32>
    %c0_9 = arith.constant 0 : index
    %c0_10 = arith.constant 0 : index
    %10 = vector.load %arg4[%c0_9, %c0_10] : memref<4x64xf32, #tpu.memory_space<vmem>>, vector<4x64xf32>
    %cst_11 = arith.constant dense<0.000000e+00> : vector<1x64xf32>
    %11 = tpu.matmul %9, %10, %cst_11 {dimension_numbers = #tpu.dot_dimension_numbers<[1], [0], [0], [1], [0, 0, 1, 1], [], []>} : vector<1x4xf32>, vector<4x64xf32>, vector<1x64xf32> -> vector<1x64xf32>
    %c0_12 = arith.constant 0 : index
    %c0_13 = arith.constant 0 : index
    %12 = vector.load %arg5[%c0_12, %c0_13] : memref<1x64xf32, #tpu.memory_space<vmem>>, vector<1x64xf32>
    %13 = arith.addf %11, %12 : vector<1x64xf32>
    %14 = vector.shape_cast %13 : vector<1x64xf32> to vector<1x64x1xf32>
    %15 = vector.shape_cast %14 : vector<1x64x1xf32> to vector<1x64x1xf32>
    %16 = vector.broadcast %15 : vector<1x64x1xf32> to vector<1x64x256xf32>
    %c0_14 = arith.constant 0 : index
    %c0_15 = arith.constant 0 : index
    %c0_16 = arith.constant 0 : index
    %17 = vector.load %arg6[%c0_14, %c0_15, %c0_16] : memref<1x64x256xf32, #tpu.memory_space<vmem>>, vector<1x64x256xf32>
    tpu.vector_store %arg6[%c0_14, %c0_15, %c0_16], %16 {strides = array<i32>} : memref<1x64x256xf32, #tpu.memory_space<vmem>>, vector<1x64x256xf32>,
    return
  }
  func.func @transform_0(%arg0: i32) -> (i32, i32, i32) {
    %c0_i32 = arith.constant 0 : i32
    %c0_i32_0 = arith.constant 0 : i32
    %c0_i32_1 = arith.constant 0 : i32
    return %arg0, %c0_i32, %c0_i32_0 : i32, i32, i32
  }
  func.func @transform_1(%arg0: i32) -> (i32, i32) {
    %c0_i32 = arith.constant 0 : i32
    %c0_i32_0 = arith.constant 0 : i32
    %c0_i32_1 = arith.constant 0 : i32
    return %c0_i32, %c0_i32_0 : i32, i32
  }
  func.func @transform_2(%arg0: i32) -> (i32, i32) {
    %c0_i32 = arith.constant 0 : i32
    %c0_i32_0 = arith.constant 0 : i32
    %c0_i32_1 = arith.constant 0 : i32
    return %c0_i32, %c0_i32_0 : i32, i32
  }
  func.func @transform_3(%arg0: i32) -> (i32, i32) {
    %c0_i32 = arith.constant 0 : i32
    %c0_i32_0 = arith.constant 0 : i32
    %c0_i32_1 = arith.constant 0 : i32
    return %c0_i32, %c0_i32_0 : i32, i32
  }
  func.func @transform_4(%arg0: i32) -> (i32, i32) {
    %c0_i32 = arith.constant 0 : i32
    %c0_i32_0 = arith.constant 0 : i32
    %c0_i32_1 = arith.constant 0 : i32
    return %c0_i32, %c0_i32_0 : i32, i32
  }
  func.func @transform_5(%arg0: i32) -> (i32, i32, i32) {
    %c0_i32 = arith.constant 0 : i32
    %c0_i32_0 = arith.constant 0 : i32
    %c0_i32_1 = arith.constant 0 : i32
    return %arg0, %c0_i32, %c0_i32_0 : i32, i32, i32
  }
}

</mosaic_0001>

<bundles_post_ra>
// kernel: tpu_custom_call.1
= control target key start
LH: loop header
LB: loop body
LE: loop exit
PB: predicated region body
PF: predicated region fallthrough
CT: control target
= control target key end

     0   :  { %10 = vsyncpa [#allocation3], 0  ;;  %s923_s0 = inlined_call_operand.hbm [shape: f32[2,64,256], index: 0, kind: input, shape index: {}]   ;;  %s924_s1 = inlined_call_operand.vmem [shape: f32[64,4], index: 1, kind: input, shape index: {}]   ;;  %s925_s2 = inlined_call_operand.vmem [shape: f32[1,4], index: 2, kind: input, shape index: {}]   ;;  %s926_s3 = inlined_call_operand.vmem [shape: f32[4,64], index: 3, kind: input, shape index: {}]   ;;  %s927_s4 = inlined_call_operand.vmem [shape: f32[1,64], index: 4, kind: input, shape index: {}]   ;;  %s928_s5 = inlined_call_operand.hbm [shape: f32[2,64,256], index: 5, kind: output, shape index: {}]  }
   0x1   :  { %12 = vsyncpa [#allocation3 + $0x1], 0 }
   0x2   :  { %13 = vsyncpa [#allocation4], 0 }
   0x3   :  { %15 = vsyncpa [#allocation4 + $0x1], 0  ;;  %s759_s18 = smov 0   ;;  %s761_s19 = smov 0  }
   0x4   :  { %s763_s20 = smov 0   ;;  %s765_s21 = smov 0  }
   0x5 LB: > { %s780_s22 = sadd.s32 4294967295, %s723_s21   ;;  %s549_s23 = sadd.s32 4294967294, %s723_s21   ;;  %s723_s21 = sphi %s765_s21, %s938_s21   ;;  %s719_s20 = sphi %s763_s20, %s937_s20   ;;  %s715_s19 = sphi %s761_s19, %s936_s19   ;;  %s711_s18 = sphi %s759_s18, %s935_s18  }
   0x6   : > { %s784_s24 = sadd.s32 1, %s723_s21   ;;  %s28_s25 = sadd.s32 1, %s719_s20 }
   0x7   : > { %s25_s26 = ssub.s32 %s723_s21, %s784_s24  ;;  %p35_p0 = scmp.ne.s32.totalorder %s719_s20, %s715_s19 }
   0x8   : > { %p26_p1 = scmp.eq.s32.totalorder %s25_s26, 0  ;;  %p36_p2 = scmp.eq.s32.totalorder %s723_s21, 0 }
   0x9   : > { %p41_p3 = scmp.ne.s32.totalorder %s715_s19, %s711_s18  ;;  %p42_p4 = scmp.eq.s32.totalorder %s780_s22, 0 }
   0xa   : > { %s796_s27 = scalar_select %p26_p1, %s719_s20, %s28_s25  }
   0xb   : > { %p798_p5 = por %p36_p2, %p35_p0  ;;  %p802_p6 = por %p42_p4, %p41_p3 }
   0xc   : > { %p149_p7 = scmp.eq.s32.totalorder %s780_s22, 1  ;;  %p155_p8 = scmp.eq.s32.totalorder %s549_s23, 1 }
   0xd   : > { %p580_p10 = scmp.lt.s32.totalorder %s723_s21, 2  ;;  %s187_s7 = sand.u32 1, %s719_s20  }
   0xe   : > { %p809_p11 = por %p149_p7, %p35_p0  ;;  %p813_p12 = por %p155_p8, %p41_p3 }
   0xf   : > { %s566_s8 = sshll.u32 %s723_s21, 7  ;;  %s552_s9 = sshll.u32 %s187_s7, 7 }
  0x10   : > { %s196_s12 = scalar_lea.hbm %s923_s0, %s566_s8  ;;  %s191_s14 = scalar_lea.vmem [#allocation2], %s552_s9 }
  0x11   : > { %s197_s13 = sshll.u32 %s196_s12, 4  ;;  %s199_s15 = sshll.u32 %s191_s14, 4  ;;  %s198_s13 = int_to_ptr.hbm [resolvable:$true] %s197_s13  ;;  %s200_s15 = int_to_ptr.vmem [resolvable:$true] %s199_s15 }
  0x12   : > { %p824_p13 = pnand %p580_p10, %p798_p5  ;;  %p555_p0 = scmp.ge.s32.totalorder %s723_s21, 1 }
  0x13   : > { %p207_p1 = scmp.lt.s32.totalorder %s723_s21, 3  ;;  %s188_s17 = scalar_lea.sflag [#allocation3], %s187_s7 }
  0x14   : > { %s627_s23 = sshra.s32 %s198_s13, 4  ;;  %p631_p3 = pneg %p824_p13  ;;  %s628_s23 = int_to_ptr.hbm [resolvable:$true] %s627_s23 }
  0x15   : > { %s629_s25 = scalar_lea.hbm %s628_s23, 128  ;;  %s634_s28 = scalar_lea.hbm %s923_s0, 256 }
  0x16   : > { %p630_p2 = scmp.ne.s32.totalorder %s628_s23, %s629_s25  ;;  %p635_p5 = scmp.lt.s32.totalorder %s628_s23, %s923_s0 }
  0x17   : > { %p636_p8 = scmp.lt.s32.totalorder %s634_s28, %s629_s25 }
  0x18   : > { %p632_p4 = pnand %p631_p3, %p630_p2 }
  0x19   : > { %p637_p10 = por %p636_p8, %p635_p5 }
  0x1a   : > { %p633_p7 = pneg %p632_p4 }
  0x1c   : > { %p638_p9 = pnand %p637_p10, %p633_p7 }
  0x1e   : > { %641 = shalt.err (!%p638_p9)
}
  0x1f   : > { %s725_s7 = smov 256   ;;  %s726_s11 = smov 16  }
  0x20   : > { %575 = dma.hbm_to_vmem [thread:$0]  (!%p824_p13), %s198_s13, 2048, %s200_s15, %s188_s17, %s725_s7, %s725_s7, %s726_s11  }
  0x21   : > { %p208_p2 = pnand %p555_p0, %p207_p1 }
  0x22   : > { %s845_s12 = sand.u32 (!%p208_p2), 1, %s715_s19  }
  0x23   : > { %211 = sbr.rel (%p208_p2) target bundleno = 594 (0x252), region = 40  ;;  %s556_s14 = sshll.u32 (!%p208_p2), %s845_s12, 7 }
  0x24   : > { %s214_s23 = scalar_lea.sflag (!%p208_p2), [#allocation3], %s845_s12  ;;  %s217_s25 = scalar_lea.vmem (!%p208_p2), [#allocation2], %s556_s14 }
  0x28   : > { %702 = dma.done.wait (%p802_p6), %s214_s23, 2048  }
  0x29   : > { %704 = vsyncadd (%p802_p6), %s214_s23, 4294965248  ;;  %v245_v0 = vld [vmem:[%s217_s25] sm:$0xff]  ;;  %v246_v1 = vld [vmem:[%s217_s25 + $0x8] sm:$0xff]  ;;  %v310_v32 = vlaneseq  ;;  %vm315_vm0 = vcmask 130112   ;;  %vm319_vm1 = vcmask 195712   ;;  %vm323_vm2 = vcmask 261312  }
  0x2a   : > { %v249_v2 = vld [vmem:[%s217_s25 + $0x20] sm:$0xff]  ;;  %v261_v3 = vadd.f32 %v246_v1, %v245_v0  ;;  %v250_v4 = vld [vmem:[%s217_s25 + $0x28] sm:$0xff]  ;;  %v247_v9 = vld [vmem:[%s217_s25 + $0x10] sm:$0xff]  ;;  %vm327_vm3 = vcmask 326912   ;;  %vm331_vm4 = vcmask 392512   ;;  %vm335_vm5 = vcmask 458112  }
  0x2b   : > { %v253_v5 = vld [vmem:[%s217_s25 + $0x40] sm:$0xff]  ;;  %v254_v6 = vld [vmem:[%s217_s25 + $0x48] sm:$0xff]  ;;  %v267_v7 = vadd.f32 %v250_v4, %v249_v2  ;;  %v248_v10 = vld [vmem:[%s217_s25 + $0x18] sm:$0xff]  ;;  %v311_v36 = vand.u32 127, %v310_v32  ;;  %vm339_vm6 = vcmask 523712   ;;  %vm341_vm7 = vcmask 523264  }
  0x2c   : > { %v273_v8 = vadd.f32 %v254_v6, %v253_v5  ;;  %262 = vadd.xlane.f32.xlu0 %v261_v3  ;;  %v251_v11 = vld [vmem:[%s217_s25 + $0x30] sm:$0xff]  ;;  %v252_v12 = vld [vmem:[%s217_s25 + $0x38] sm:$0xff]  ;;  %v264_v15 = vadd.f32 %v248_v10, %v247_v9  ;;  %v257_v18 = vld [vmem:[%s217_s25 + $0x60] sm:$0xff]  ;;  %vm371_vm8 = vcmask 1043456   ;;  %v397_v9 = vshrl.u32 %v310_v32, 7  ;;  %s244_s9 = scalar_lea.vmem [#allocation5], %s556_s14 }
  0x2d   : > { %268 = vadd.xlane.f32.xlu1 %v267_v7  ;;  %v255_v13 = vld [vmem:[%s217_s25 + $0x50] sm:$0xff]  ;;  %v256_v14 = vld [vmem:[%s217_s25 + $0x58] sm:$0xff]  ;;  %v270_v16 = vadd.f32 %v252_v12, %v251_v11  ;;  %v258_v19 = vld [vmem:[%s217_s25 + $0x68] sm:$0xff]  ;;  %v313_v38 = vadd.s32 4294967288, %v311_v36  ;;  %v317_v39 = vadd.s32 4294967280, %v311_v36  ;;  %v321_v42 = vadd.s32 4294967272, %v311_v36 }
  0x2e   : > { %274 = vadd.xlane.f32.xlu2 %v273_v8  ;;  %v276_v17 = vadd.f32 %v256_v14, %v255_v13  ;;  %v259_v20 = vld [vmem:[%s217_s25 + $0x70] sm:$0xff]  ;;  %v260_v21 = vld [vmem:[%s217_s25 + $0x78] sm:$0xff]  ;;  %v279_v22 = vadd.f32 %v258_v19, %v257_v18  ;;  %v298_v26 = vld [vmem:[%s924_s1 + $0x28] sm:$0xff]  ;;  %v325_v46 = vadd.s32 4294967264, %v311_v36  ;;  %v329_v53 = vadd.s32 4294967256, %v311_v36  ;;  %s567_s14 = sshll.u32 %s780_s22, 7 }
  0x2f   : > { %v282_v23 = vadd.f32 %v260_v21, %v259_v20  ;;  %v300_v24 = vld [vmem:[%s924_s1 + $0x38] sm:$0xff]  ;;  %v299_v25 = vld [vmem:[%s924_s1 + $0x30] sm:$0xff]  ;;  %v297_v27 = vld [vmem:[%s924_s1 + $0x20] sm:$0xff]  ;;  %v333_v59 = vadd.s32 4294967248, %v311_v36  ;;  %v337_v62 = vadd.s32 4294967240, %v311_v36  ;;  %618 = vset.pattern.permute.xlu2 %v397_v9  ;;  %v410_v10 = vadd.s32 16, %v397_v9  ;;  %s472_s11 = scalar_lea.hbm %s928_s5, %s567_s14 }
  0x30   : > { %352 = vmatpush.msra.mxu0 %v300_v24  ;;  %v296_v28 = vld [vmem:[%s924_s1 + $0x18] sm:$0xff]  ;;  %v295_v29 = vld [vmem:[%s924_s1 + $0x10] sm:$0xff]  ;;  %v294_v30 = vld [vmem:[%s924_s1 + $0x8] sm:$0xff]  ;;  %v404_v11 = vadd.s32 8, %v397_v9  ;;  %vm367_vm9 = vcmask 31744   ;;  %v428_v20 = vadd.s32 40, %v397_v9 }
  0x31   : > { %v293_v31 = vld [vmem:[%s924_s1] sm:$0xff]  ;;  %620 = vset.pattern.permute.xlu1 %v410_v10  ;;  %v416_v21 = vadd.s32 24, %v397_v9  ;;  %v434_v24 = vadd.s32 48, %v397_v9  ;;  %s473_s23 = sshll.u32 %s244_s9, 4  ;;  %s475_s25 = sshll.u32 %s472_s11, 4  ;;  %s474_s23 = int_to_ptr.vmem [resolvable:$true] %s473_s23  ;;  %s476_s25 = int_to_ptr.hbm [resolvable:$true] %s475_s25 }
  0x32   : > { %353 = vmatpush.msra.mxu0 %v299_v25  ;;  %v365_v8 = vld [vmem:[%s926_s3] sm:$0xf]  ;;  %619 = vset.pattern.permute.xlu0 %v404_v11  ;;  %s461_s29 = scalar_lea.sflag [#allocation4], %s845_s12  ;;  %s671_s13 = sshra.s32 %s476_s25, 4  ;;  %s672_s13 = int_to_ptr.hbm [resolvable:$true] %s671_s13 }
  0x33   : > { %559 = vmatpush.msk.msra.mxu1 %vm371_vm8, %v365_v8  ;;  %v301_v12 = vld [vmem:[%s925_s2] sm:$0x1]  ;;  %s673_s15 = scalar_lea.hbm %s672_s13, 128  ;;  %s677_s17 = scalar_lea.hbm %s928_s5, 256 }
  0x34   : > { %265 = vadd.xlane.f32.xlu0 %v264_v15  ;;  %354 = vmatpush.msra.mxu0 %v298_v26  ;;  %p674_p6 = scmp.ne.s32.totalorder %s672_s13, %s673_s15  ;;  %p678_p0 = scmp.lt.s32.totalorder %s672_s13, %s928_s5 }
  0x35   : > { %271 = vadd.xlane.f32.xlu1 %v270_v16  ;;  %v366_v16 = vld [vmem:[%s927_s4] sm:$0x1]  ;;  %p679_p1 = scmp.lt.s32.totalorder %s677_s17, %s673_s15 }
  0x36   : > { %277 = vadd.xlane.f32.xlu2 %v276_v17  ;;  %355 = vmatpush.msra.mxu0 %v297_v27  ;;  %p675_p9 = pnand %p674_p6, %p809_p11 }
  0x37   : > { %p680_p3 = por %p679_p1, %p678_p0 }
  0x38   : > { %356 = vmatpush.msra.mxu0 %v296_v28  ;;  %p676_p13 = pneg %p675_p9 }
  0x3a   : > { %357 = vmatpush.msra.mxu0 %v295_v29  ;;  %p681_p4 = pnand %p680_p3, %p676_p13 }
  0x3c   : > { %280 = vadd.xlane.f32.xlu0 %v279_v22  ;;  %358 = vmatpush.msra.mxu0 %v294_v30  ;;  %v440_v22 = vadd.s32 56, %v397_v9 }
  0x3d   : > { %283 = vadd.xlane.f32.xlu1 %v282_v23  ;;  %v422_v23 = vadd.s32 32, %v397_v9 }
  0x3e   : > { %359 = vmatpush.msra.mxu0 %v293_v31 }
  0x9f   : > { %v263_v33 = vpop.xlane.xlu0 %262 }
  0xa0   : > { %v269_v34 = vpop.xlane.xlu1 %268  ;;  %v285_v37 = vmul.f32 0.00390625, %v263_v33 }
  0xa1   : > { %v275_v35 = vpop.xlane.xlu2 %274  ;;  %v287_v40 = vmul.f32 0.00390625, %v269_v34 }
  0xa2   : > { %v312_v48 = vperm.slane %v285_v37, %v311_v36  ;;  %v289_v49 = vmul.f32 0.00390625, %v275_v35 }
  0xa3   : > { %v318_v51 = vperm.slane %v287_v40, %v317_v39 }
  0xa4   : > { %v326_v57 = vperm.slane %v289_v49, %v325_v46 }
  0xa7   : > { %v266_v41 = vpop.xlane.xlu0 %265 }
  0xa8   : > { %v286_v43 = vmul.f32 0.00390625, %v266_v41  ;;  %v272_v44 = vpop.xlane.xlu1 %271 }
  0xa9   : > { %v278_v45 = vpop.xlane.xlu2 %277  ;;  %v288_v47 = vmul.f32 0.00390625, %v272_v44 }
  0xaa   : > { %v314_v50 = vperm.slane %v286_v43, %v313_v38  ;;  %v290_v54 = vmul.f32 0.00390625, %v278_v45 }
  0xab   : > { %v322_v52 = vperm.slane %v288_v47, %v321_v42 }
  0xac   : > { %v316_v55 = vsel %vm315_vm0, %v314_v50, %v312_v48  ;;  %v330_v60 = vperm.slane %v290_v54, %v329_v53 }
  0xad   : > { %v320_v56 = vsel %vm319_vm1, %v318_v51, %v316_v55 }
  0xae   : > { %v324_v58 = vsel %vm323_vm2, %v322_v52, %v320_v56 }
  0xaf   : > { %v281_v61 = vpop.xlane.xlu0 %280  ;;  %v328_v1 = vsel %vm327_vm3, %v326_v57, %v324_v58 }
  0xb0   : > { %v291_v63 = vmul.f32 0.00390625, %v281_v61  ;;  %v284_v0 = vpop.xlane.xlu1 %283  ;;  %v332_v5 = vsel %vm331_vm4, %v330_v60, %v328_v1 }
  0xb1   : > { %v292_v2 = vmul.f32 0.00390625, %v284_v0 }
  0xb2   : > { %v334_v3 = vperm.slane %v291_v63, %v333_v59 }
  0xb3   : > { %v338_v4 = vperm.slane %v292_v2, %v337_v62 }
  0xb4   : > { %v336_v6 = vsel %vm335_vm5, %v334_v3, %v332_v5 }
  0xb5   : > { %v340_v7 = vsel %vm339_vm6, %v338_v4, %v336_v6 }
  0xb6   : > { %558 = vmatmul.msk.f32.vlgmr.msra.gmra.mxu0 %vm341_vm7, %v340_v7 }
 0x133   : > { %v361_v13 = vpop.f32.mrf.mxu0 }
 0x134   : > { %v362_v14 = vadd.f32 %v361_v13, %v301_v12 }
 0x136   : > { %v364_v15 = vmax.f32 %v362_v14, 0.0 }
 0x138   : > { %560 = vmatmul.msk.f32.vlgmr.msra.gmra.mxu1 %vm367_vm9, %v364_v15 }
 0x1b5   : > { %v392_v17 = vpop.f32.mrf.mxu1 }
 0x1b6   : > { %v393_v18 = vadd.f32 %v392_v17, %v366_v16 }
 0x1b8   : > { %v395_v19 = vperm.slane %v393_v18, 0 }
 0x1ba   : > { %412 = vperm.xlu1 %620, %v395_v19   ;;  %406 = vperm.xlu0 %619, %v395_v19  }
 0x1bb   : > { %400 = vperm.xlu2 %618, %v395_v19  }
 0x1c2   : > { %623 = vset.pattern.permute.xlu1 %v428_v20  ;;  %626 = vset.pattern.permute.xlu0 %v440_v22 }
 0x1c3   : > { %621 = vset.pattern.permute.xlu2 %v416_v21 }
 0x1ca   : > { %430 = vperm.xlu1 %623, %v395_v19  }
 0x1cb   : > { %418 = vperm.xlu2 %621, %v395_v19  }
 0x1d2   : > { %625 = vset.pattern.permute.xlu1 %v440_v22 }
 0x1d3   : > { %622 = vset.pattern.permute.xlu2 %v422_v23 }
 0x1da   : > { %442 = vperm.xlu1 %625, %v395_v19  }
 0x1db   : > { %424 = vperm.xlu2 %622, %v395_v19  }
 0x1e3   : > { %624 = vset.pattern.permute.xlu2 %v434_v24 }
 0x1eb   : > { %436 = vperm.xlu2 %624, %v395_v19  }
 0x215   : > { %v401_v25 = vpop.permute.xlu2 %400 }
 0x216   : > { %444 = vst [vmem:[%s244_s9] sm:$0xff] %v401_v25 }
 0x217   : > { %445 = vst [vmem:[%s244_s9 + $0x8] sm:$0xff] %v401_v25 }
 0x225   : > { %v419_v26 = vpop.permute.xlu2 %418 }
 0x226   : > { %450 = vst [vmem:[%s244_s9 + $0x30] sm:$0xff] %v419_v26 }
 0x227   : > { %451 = vst [vmem:[%s244_s9 + $0x38] sm:$0xff] %v419_v26 }
 0x22c   : > { %v413_v27 = vpop.permute.xlu1 %412  ;;  %v407_v28 = vpop.permute.xlu0 %406 }
 0x22d   : > { %448 = vst [vmem:[%s244_s9 + $0x20] sm:$0xff] %v413_v27 }
 0x22e   : > { %449 = vst [vmem:[%s244_s9 + $0x28] sm:$0xff] %v413_v27 }
 0x22f   : > { %446 = vst [vmem:[%s244_s9 + $0x10] sm:$0xff] %v407_v28 }
 0x230   : > { %447 = vst [vmem:[%s244_s9 + $0x18] sm:$0xff] %v407_v28 }
 0x235   : > { %v425_v29 = vpop.permute.xlu2 %424 }
 0x236   : > { %452 = vst [vmem:[%s244_s9 + $0x40] sm:$0xff] %v425_v29 }
 0x237   : > { %453 = vst [vmem:[%s244_s9 + $0x48] sm:$0xff] %v425_v29 }
 0x23c   : > { %v431_v30 = vpop.permute.xlu1 %430 }
 0x23d   : > { %454 = vst [vmem:[%s244_s9 + $0x50] sm:$0xff] %v431_v30 }
 0x23e   : > { %455 = vst [vmem:[%s244_s9 + $0x58] sm:$0xff] %v431_v30 }
 0x245   : > { %v437_v31 = vpop.permute.xlu2 %436 }
 0x246   : > { %456 = vst [vmem:[%s244_s9 + $0x60] sm:$0xff] %v437_v31 }
 0x247   : > { %457 = vst [vmem:[%s244_s9 + $0x68] sm:$0xff] %v437_v31 }
 0x24c   : > { %v443_v32 = vpop.permute.xlu1 %442 }
 0x24d   : > { %458 = vst [vmem:[%s244_s9 + $0x70] sm:$0xff] %v443_v32 }
 0x24e   : > { %459 = vst [vmem:[%s244_s9 + $0x78] sm:$0xff] %v443_v32 }
 0x24f   : > { %684 = shalt.err (!%p681_p4)
}
 0x250   : > { %s727_s12 = smov 256   ;;  %s728_s28 = smov 16  }
 0x251   : > { %570 = dma.vmem_to_hbm [thread:$0]  (%p809_p11), %s474_s23, 2048, %s476_s25, %s461_s29, %s727_s12, %s727_s12, %s728_s28  }
 0x252 PF: > { %s490_s9 = sand.u32 1, %s711_s18   ;;  %p934_p7 = scmp.ge.s32.totalorder %s723_s21, 2 }
 0x253   : > { %s491_s14 = scalar_lea.sflag [#allocation4], %s490_s9 }
 0x254   : > { %p577_p5 = pnand %p934_p7, %p813_p12 }
 0x256   : > { %p578_p8 = pneg %p577_p5 }
 0x258   : > { %706 = dma.done.wait (%p578_p8), %s491_s14, 2048  }
 0x259   : > { %708 = vsyncadd (%p578_p8), %s491_s14, 4294965248  ;;  %p18_p10 = scmp.ge.s32.totalorder %s784_s24, 4   ;;  %s935_s18 = smov %s715_s19 }
 0x25a   : > { %s936_s19 = smov %s719_s20  ;;  %s937_s20 = smov %s796_s27 }
 0x25b   : > { %s938_s21 = smov %s784_s24  ;;  %20 = sbr.rel (!%p18_p10) target bundleno = 5 (0x5), region = 85 }
 0x260   :  { %497 = vsyncpa [#allocation3], 1 }
 0x261   :  { %499 = vsyncpa [#allocation3 + $0x1], 1 }
 0x262   :  { %500 = vsyncpa [#allocation4], 1 }
 0x263   :  { %502 = vsyncpa [#allocation4 + $0x1], 1 }

</bundles_post_ra>
